<compile_context>
chip_gen: v5e
topology: v5e:2x2
jax: 0.10.0
libtpu: 0.0.40
codegen_flags: <defaults>
</compile_context>

<pallas_src>
import numpy as np
import jax
import jax.numpy as jnp
from jax import lax
from jax.experimental import pallas as pl
from jax.experimental.pallas import tpu as pltpu


# -----------------------------------------------------------------------------
# Pallas kernel: one batch-tile (TB batch elements, all nodes) per grid step.
# Layout: channels on sublanes, (batch * nodes) on lanes.
# -----------------------------------------------------------------------------
def spatial_encoder_kernel(xmu_ref, h_ref, adj_ref,
                           w_xmu_ref, w_hin_ref, b_in_ref,
                           w_gc_ref, b_gc_ref,
                           w_out_a_ref, w_out_b_ref, b_out_ref,
                           w_ro_a_ref, w_ro_b_ref, b_ro_ref,
                           alpha_ref,
                           y_ref, out2_ref):
    f32 = jnp.float32
    bf16 = jnp.bfloat16

    xmu = xmu_ref[...]                       # [c_xmu,    L]   bf16
    h = h_ref[...]                           # [d_hidden, L]   bf16
    n_support = adj_ref.shape[0]
    d_model = w_gc_ref.shape[1]
    L = xmu.shape[1]

    # lin_in (1x1 conv) on cat([x, m, u, h]) via split weights
    # (h enters through its own weight block -> no concat, h DMA'd once).
    x1 = (jnp.dot(w_xmu_ref[...], xmu, preferred_element_type=f32)
          + jnp.dot(w_hin_ref[...], h, preferred_element_type=f32)
          + b_in_ref[...])                   # [d_model, L]    f32
    x1_bf = x1.astype(bf16)

    # Graph conv (order=1, include_self=False) fused with its 1x1 mlp:
    #   out_gc = sum_s Wgc_s @ (x1 @ A_s^T) = sum_s (Wgc_s @ x1) @ A_s^T
    # A_s is block-diagonal over the TB batch elements of this tile, so the
    # node contraction stays in the flat [d_model, L] layout (no z_cat copy).
    out_gc = None
    for s in range(n_support):               # static unrolled loop, S is tiny
        y_s = jnp.dot(w_gc_ref[s], x1_bf, preferred_element_type=f32)
        term = lax.dot_general(
            y_s.astype(bf16), adj_ref[s],
            dimension_numbers=(((1,), (1,)), ((), ())),   # contract node axis
            preferred_element_type=f32)
        out_gc = term if out_gc is None else out_gc + term
    out_gc = out_gc + b_gc_ref[...]          # [d_model, L]    f32
    out_gc_bf = out_gc.astype(bf16)

    # lin_out on cat([out_gc, h]) via split weights, then PReLU.
    pre = (jnp.dot(w_out_a_ref[...], out_gc_bf, preferred_element_type=f32)
           + jnp.dot(w_out_b_ref[...], h, preferred_element_type=f32)
           + b_out_ref[...])                 # [d_model, L]    f32
    alpha = alpha_ref[0]                     # scalar PReLU slope from SMEM
    act = jnp.where(pre >= 0, pre, alpha * pre)
    act_bf = act.astype(bf16)

    # Second output cat([act, h]): two ref stores instead of a concat copy.
    out2_ref[:d_model, :] = act.astype(out2_ref.dtype)
    out2_ref[d_model:, :] = h.astype(out2_ref.dtype)

    # read_out on cat([act, h]) via split weights.
    y = (jnp.dot(w_ro_a_ref[...], act_bf, preferred_element_type=f32)
         + jnp.dot(w_ro_b_ref[...], h, preferred_element_type=f32)
         + b_ro_ref[...])                    # [d_out, L]      f32
    y_ref[...] = y.astype(y_ref.dtype)


# -----------------------------------------------------------------------------
# Layout helpers + wrapper
# -----------------------------------------------------------------------------
def _to_lane_dense(a):
    # [B, C, N] -> [C, B*N]   (batch*nodes on the TPU lane axis)
    B, C, N = a.shape
    return jnp.transpose(a, (1, 0, 2)).reshape(C, B * N)


def _from_lane_dense(a, B, N):
    # [C, B*N] -> [B, C, N]
    C = a.shape[0]
    return jnp.transpose(a.reshape(C, B, N), (1, 0, 2))


def _pick_batch_tile(B, N):
    """Batch elements per grid step.

    If N is already a multiple of 128, one batch element per step keeps the
    lane axis dense with NO adjacency blow-up and >=2 grid steps (megacore).
    Otherwise prefer the smallest tile whose lane width (TB*N) is a multiple
    of 128 and >= 256 lanes; as a last resort process the whole batch in one
    step so every block covers the full lane axis and stores stay unmasked.
    """
    if N % 128 == 0:
        return 1
    candidates = [d for d in range(1, B) if B % d == 0 and (d * N) % 128 == 0]
    for d in candidates:                      # ascending: smallest >= 256 lanes
        if d * N >= 256:
            return d
    if candidates:
        return candidates[-1]
    return B


def spatial_encoder_forward(x, m, h, u, adj, params, *, batch_tile=None):
    """SpatialEncoder forward (attention_block=False, order=1, dropout=0.0).

    x: [B, c_x, N], m: [B, c_m, N], u: [B, c_u, N] or None, h: [B, d_hidden, N]
    adj: [S, N, N] stacked supports.
    Returns ([B, d_out, N], [B, d_model + d_hidden, N]).
    """
    bf16 = jnp.bfloat16
    B, _, N = x.shape
    d_hidden = h.shape[1]
    S = adj.shape[0]

    # Only the tiny leading channels are concatenated XLA-side; the wide h
    # block is passed once and mixed through a split weight.
    xmu = jnp.concatenate([x, m] + ([] if u is None else [u]), axis=1)
    c_xmu = xmu.shape[1]

    w_in = params["w_in"]                    # [d_model, c_xmu + d_hidden]
    d_model = w_in.shape[0]
    w_gc = params["w_gc"]                    # [d_model, S*d_model]
    w_out = params["w_out"]                  # [d_model, d_model + d_hidden]
    w_ro = params["w_ro"]                    # [d_out,   d_model + d_hidden]
    d_out = w_ro.shape[0]

    # Split weights so no concatenation is needed inside the kernel.
    w_xmu = w_in[:, :c_xmu].astype(bf16)
    w_hin = w_in[:, c_xmu:].astype(bf16)
    w_gc_s = jnp.transpose(w_gc.reshape(d_model, S, d_model), (1, 0, 2)).astype(bf16)
    w_out_a = w_out[:, :d_model].astype(bf16)
    w_out_b = w_out[:, d_model:].astype(bf16)
    w_ro_a = w_ro[:, :d_model].astype(bf16)
    w_ro_b = w_ro[:, d_model:].astype(bf16)

    TB = batch_tile if batch_tile is not None else _pick_batch_tile(B, N)
    assert B % TB == 0, "batch tile must divide the batch size"
    L = TB * N
    grid = (B // TB,)

    # Block-diagonal supports over the TB batch elements of one tile so the
    # graph conv stays in the lane-dense [d_model, TB*N] layout (identity when
    # TB == 1).
    if TB == 1:
        adj_blk = adj.astype(bf16)
    else:
        eye_tb = jnp.eye(TB, dtype=adj.dtype)
        adj_blk = jnp.stack(
            [jnp.kron(eye_tb, adj[s]) for s in range(S)], 0).astype(bf16)

    xmu_f = _to_lane_dense(xmu).astype(bf16)     # [c_xmu,    B*N]
    h_f = _to_lane_dense(h).astype(bf16)         # [d_hidden, B*N]

    full2d = lambda b: (0, 0)
    full3d = lambda b: (0, 0, 0)
    lane_tile = lambda b: (0, b)

    grid_spec = pltpu.PrefetchScalarGridSpec(
        num_scalar_prefetch=0,
        grid=grid,
        in_specs=[
            pl.BlockSpec((c_xmu, L), lane_tile),                # xmu
            pl.BlockSpec((d_hidden, L), lane_tile),             # h
            pl.BlockSpec((S, L, L), full3d),                    # block-diag supports
            pl.BlockSpec((d_model, c_xmu), full2d),             # w_in[:, :c_xmu]
            pl.BlockSpec((d_model, d_hidden), full2d),          # w_in[:, c_xmu:]
            pl.BlockSpec((d_model, 1), full2d),                 # b_in
            pl.BlockSpec((S, d_model, d_model), full3d),        # w_gc per support
            pl.BlockSpec((d_model, 1), full2d),                 # b_gc
            pl.BlockSpec((d_model, d_model), full2d),           # w_out[:, :d_model]
            pl.BlockSpec((d_model, d_hidden), full2d),          # w_out[:, d_model:]
            pl.BlockSpec((d_model, 1), full2d),                 # b_out
            pl.BlockSpec((d_out, d_model), full2d),             # w_ro[:, :d_model]
            pl.BlockSpec((d_out, d_hidden), full2d),            # w_ro[:, d_model:]
            pl.BlockSpec((d_out, 1), full2d),                   # b_ro
            pl.BlockSpec(memory_space=pltpu.MemorySpace.SMEM),  # PReLU alpha
        ],
        out_specs=[
            pl.BlockSpec((d_out, L), lane_tile),
            pl.BlockSpec((d_model + d_hidden, L), lane_tile),
        ],
    )

    y_f, out2_f = pl.pallas_call(
        spatial_encoder_kernel,
        out_shape=(
            jax.ShapeDtypeStruct((d_out, B * N), jnp.float32),
            jax.ShapeDtypeStruct((d_model + d_hidden, B * N), jnp.float32),
        ),
        grid_spec=grid_spec,
        compiler_params=pltpu.CompilerParams(
            dimension_semantics=("parallel",),
            vmem_limit_bytes=32 * 1024 * 1024),
    )(xmu_f, h_f, adj_blk,
      w_xmu, w_hin, params["b_in"],
      w_gc_s, params["b_gc"],
      w_out_a, w_out_b, params["b_out"],
      w_ro_a, w_ro_b, params["b_ro"],
      params["alpha"])

    return _from_lane_dense(y_f, B, N), _from_lane_dense(out2_f, B, N)


# -----------------------------------------------------------------------------
# Pure-JAX f32 reference (matches the PyTorch forward semantics)
# -----------------------------------------------------------------------------
def spatial_encoder_reference(x, m, h, u, adj, params):
    x_in = jnp.concatenate([x, m, h] if u is None else [x, m, u, h], axis=1)
    x1 = jnp.einsum('oi,bin->bon', params["w_in"], x_in) + params["b_in"][None]
    z = [jnp.einsum('bcv,wv->bcw', x1, adj[s]) for s in range(adj.shape[0])]
    z = jnp.concatenate(z, axis=1)
    out = jnp.einsum('oi,bin->bon', params["w_gc"], z) + params["b_gc"][None]
    cat1 = jnp.concatenate([out, h], axis=1)
    pre = jnp.einsum('oi,bin->bon', params["w_out"], cat1) + params["b_out"][None]
    alpha = params["alpha"][0]
    act = jnp.where(pre >= 0, pre, alpha * pre)
    cat2 = jnp.concatenate([act, h], axis=1)
    y = jnp.einsum('oi,bin->bon', params["w_ro"], cat2) + params["b_ro"][None]
    return y, cat2


# -----------------------------------------------------------------------------
# Deterministic parameter init (matches the module's __init__ shapes)
# -----------------------------------------------------------------------------
def _xavier_uniform(key, shape):
    fan_out, fan_in = shape
    bound = float(np.sqrt(6.0 / (fan_in + fan_out)))
    return jax.random.uniform(key, shape, jnp.float32, -bound, bound)


def _uniform_fanin(key, shape, fan_in):
    bound = 1.0 / float(np.sqrt(fan_in))
    return jax.random.uniform(key, shape, jnp.float32, -bound, bound)


def make_params(key, d_in, d_hidden, d_model, d_out, support_len):
    ks = jax.random.split(key, 8)
    return {
        # lin_in: Conv1d(d_in, d_model, 1)  (xavier_uniform weight)
        "w_in": _xavier_uniform(ks[0], (d_model, d_in)),
        "b_in": _uniform_fanin(ks[1], (d_model, 1), d_in),
        # graph_conv.mlp: Conv2d(support_len * d_model, d_model, 1)
        "w_gc": _uniform_fanin(ks[2], (d_model, support_len * d_model),
                               support_len * d_model),
        "b_gc": _uniform_fanin(ks[3], (d_model, 1), support_len * d_model),
        # lin_out: Conv1d(d_model + d_hidden, d_model, 1)
        "w_out": _xavier_uniform(ks[4], (d_model, d_model + d_hidden)),
        "b_out": _uniform_fanin(ks[5], (d_model, 1), d_model + d_hidden),
        # read_out: Conv1d(d_model + d_hidden, d_out, 1)
        "w_ro": _xavier_uniform(ks[6], (d_out, d_model + d_hidden)),
        "b_ro": _uniform_fanin(ks[7], (d_out, 1), d_model + d_hidden),
        # PReLU (single parameter, default 0.25) — read as an SMEM scalar.
        "alpha": jnp.full((1,), 0.25, jnp.float32),
    }


if __name__ == "__main__":
    # Small configuration: batch=2, nodes=16, hidden/model=32
    B, N = 2, 16
    c_x, c_m, c_u = 1, 1, 2
    d_hidden, d_model, d_out = 32, 32, 4
    support_len = 2
    d_in = c_x + c_m + c_u + d_hidden     # channels of cat([x, m, u, h])

    key = jax.random.PRNGKey(0)
    k_x, k_m, k_u, k_h, k_a, k_p = jax.random.split(key, 6)

    x = jax.random.normal(k_x, (B, c_x, N), jnp.float32)
    m = (jax.random.uniform(k_m, (B, c_m, N)) > 0.5).astype(jnp.float32)
    u = jax.random.normal(k_u, (B, c_u, N), jnp.float32)
    h = jax.random.normal(k_h, (B, d_hidden, N), jnp.float32)

    # Build the support list like SpatialConvOrderK.compute_support:
    # forward / backward row-normalized adjacency, stacked -> [S, N, N]
    raw_adj = jax.random.uniform(k_a, (N, N), jnp.float32)
    raw_adj = raw_adj * (1.0 - jnp.eye(N, dtype=jnp.float32))
    adj_fwd = raw_adj / (raw_adj.sum(1, keepdims=True) + 1e-8)
    adj_bwd = raw_adj.T / (raw_adj.T.sum(1, keepdims=True) + 1e-8)
    adj = jnp.stack([adj_fwd, adj_bwd], axis=0)

    params = make_params(k_p, d_in, d_hidden, d_model, d_out, support_len)

    y, out2 = spatial_encoder_forward(x, m, h, u, adj, params)
    jax.block_until_ready((y, out2))

    # Reference is full f32; the kernel runs bf16 operands with f32
    # accumulation, so compare with bf16-appropriate tolerances.
    y_ref, out2_ref = spatial_encoder_reference(x, m, h, u, adj, params)
    np.testing.assert_allclose(np.asarray(y), np.asarray(y_ref),
                               rtol=5e-2, atol=5e-2)
    np.testing.assert_allclose(np.asarray(out2), np.asarray(out2_ref),
                               rtol=5e-2, atol=5e-2)

    print("KERNEL_OK")
</pallas_src>

<mosaic_0001>
module attributes {stable_mosaic.version = 11 : i64} {
  func.func @spatial_encoder_kernel(%arg0: i32, %arg1: memref<4x32xbf16, #tpu.memory_space<vmem>>, %arg2: memref<32x32xbf16, #tpu.memory_space<vmem>>, %arg3: memref<2x32x32xbf16, #tpu.memory_space<vmem>>, %arg4: memref<32x4xbf16, #tpu.memory_space<vmem>>, %arg5: memref<32x32xbf16, #tpu.memory_space<vmem>>, %arg6: memref<32x1xf32, #tpu.memory_space<vmem>>, %arg7: memref<2x32x32xbf16, #tpu.memory_space<vmem>>, %arg8: memref<32x1xf32, #tpu.memory_space<vmem>>, %arg9: memref<32x32xbf16, #tpu.memory_space<vmem>>, %arg10: memref<32x32xbf16, #tpu.memory_space<vmem>>, %arg11: memref<32x1xf32, #tpu.memory_space<vmem>>, %arg12: memref<4x32xbf16, #tpu.memory_space<vmem>>, %arg13: memref<4x32xbf16, #tpu.memory_space<vmem>>, %arg14: memref<4x1xf32, #tpu.memory_space<vmem>>, %arg15: memref<1xf32, #tpu.memory_space<smem>>, %arg16: memref<4x32xf32, #tpu.memory_space<vmem>>, %arg17: memref<64x32xf32, #tpu.memory_space<vmem>>) attributes {dimension_semantics = [#tpu.dimension_semantics<parallel>], iteration_bounds = array<i64: 1>, scalar_prefetch = 0 : i64, scratch_operands = 0 : i64, tpu.core_type = #tpu.core_type<tc>, window_params = [{transform_indices = @transform_0, window_bounds = array<i64: 4, 32>}, {transform_indices = @transform_1, window_bounds = array<i64: 32, 32>}, {pipeline_mode = #tpu.pipeline_mode<synchronous>, transform_indices = @transform_2, window_bounds = array<i64: 2, 32, 32>}, {pipeline_mode = #tpu.pipeline_mode<synchronous>, transform_indices = @transform_3, window_bounds = array<i64: 32, 4>}, {pipeline_mode = #tpu.pipeline_mode<synchronous>, transform_indices = @transform_4, window_bounds = array<i64: 32, 32>}, {pipeline_mode = #tpu.pipeline_mode<synchronous>, transform_indices = @transform_5, window_bounds = array<i64: 32, 1>}, {pipeline_mode = #tpu.pipeline_mode<synchronous>, transform_indices = @transform_6, window_bounds = array<i64: 2, 32, 32>}, {pipeline_mode = #tpu.pipeline_mode<synchronous>, transform_indices = @transform_7, window_bounds = array<i64: 32, 1>}, {pipeline_mode = #tpu.pipeline_mode<synchronous>, transform_indices = @transform_8, window_bounds = array<i64: 32, 32>}, {pipeline_mode = #tpu.pipeline_mode<synchronous>, transform_indices = @transform_9, window_bounds = array<i64: 32, 32>}, {pipeline_mode = #tpu.pipeline_mode<synchronous>, transform_indices = @transform_10, window_bounds = array<i64: 32, 1>}, {pipeline_mode = #tpu.pipeline_mode<synchronous>, transform_indices = @transform_11, window_bounds = array<i64: 4, 32>}, {pipeline_mode = #tpu.pipeline_mode<synchronous>, transform_indices = @transform_12, window_bounds = array<i64: 4, 32>}, {pipeline_mode = #tpu.pipeline_mode<synchronous>, transform_indices = @transform_13, window_bounds = array<i64: 4, 1>}, {transform_indices = @transform_14, window_bounds = array<i64: 1>}, {transform_indices = @transform_15, window_bounds = array<i64: 4, 32>}, {transform_indices = @transform_16, window_bounds = array<i64: 64, 32>}]} {
    %c0 = arith.constant 0 : index
    %c0_0 = arith.constant 0 : index
    %0 = vector.load %arg1[%c0, %c0_0] : memref<4x32xbf16, #tpu.memory_space<vmem>>, vector<4x32xbf16>
    %c0_1 = arith.constant 0 : index
    %c0_2 = arith.constant 0 : index
    %1 = vector.load %arg2[%c0_1, %c0_2] : memref<32x32xbf16, #tpu.memory_space<vmem>>, vector<32x32xbf16>
    %c0_3 = arith.constant 0 : index
    %c0_4 = arith.constant 0 : index
    %2 = vector.load %arg4[%c0_3, %c0_4] : memref<32x4xbf16, #tpu.memory_space<vmem>>, vector<32x4xbf16>
    %cst = arith.constant dense<0.000000e+00> : vector<32x32xf32>
    %3 = tpu.matmul %2, %0, %cst {dimension_numbers = #tpu.dot_dimension_numbers<[1], [0], [0], [1], [0, 0, 1, 1], [], []>} : vector<32x4xbf16>, vector<4x32xbf16>, vector<32x32xf32> -> vector<32x32xf32>
    %c0_5 = arith.constant 0 : index
    %c0_6 = arith.constant 0 : index
    %4 = vector.load %arg5[%c0_5, %c0_6] : memref<32x32xbf16, #tpu.memory_space<vmem>>, vector<32x32xbf16>
    %cst_7 = arith.constant dense<0.000000e+00> : vector<32x32xf32>
    %5 = tpu.matmul %4, %1, %cst_7 {dimension_numbers = #tpu.dot_dimension_numbers<[1], [0], [0], [1], [0, 0, 1, 1], [], []>} : vector<32x32xbf16>, vector<32x32xbf16>, vector<32x32xf32> -> vector<32x32xf32>
    %6 = arith.addf %3, %5 : vector<32x32xf32>
    %c0_8 = arith.constant 0 : index
    %c0_9 = arith.constant 0 : index
    %7 = vector.load %arg6[%c0_8, %c0_9] : memref<32x1xf32, #tpu.memory_space<vmem>>, vector<32x1xf32>
    %8 = vector.broadcast %7 : vector<32x1xf32> to vector<32x32xf32>
    %9 = arith.addf %6, %8 : vector<32x32xf32>
    %10 = arith.truncf %9 : vector<32x32xf32> to vector<32x32xbf16>
    %c0_10 = arith.constant 0 : index
    %c0_11 = arith.constant 0 : index
    %c0_12 = arith.constant 0 : index
    %11 = vector.load %arg7[%c0_10, %c0_11, %c0_12] : memref<2x32x32xbf16, #tpu.memory_space<vmem>>, vector<1x32x32xbf16>
    %12 = vector.shape_cast %11 : vector<1x32x32xbf16> to vector<32x32xbf16>
    %cst_13 = arith.constant dense<0.000000e+00> : vector<32x32xf32>
    %13 = tpu.matmul %12, %10, %cst_13 {dimension_numbers = #tpu.dot_dimension_numbers<[1], [0], [0], [1], [0, 0, 1, 1], [], []>} : vector<32x32xbf16>, vector<32x32xbf16>, vector<32x32xf32> -> vector<32x32xf32>
    %14 = arith.truncf %13 : vector<32x32xf32> to vector<32x32xbf16>
    %c0_14 = arith.constant 0 : index
    %c0_15 = arith.constant 0 : index
    %c0_16 = arith.constant 0 : index
    %15 = vector.load %arg3[%c0_14, %c0_15, %c0_16] : memref<2x32x32xbf16, #tpu.memory_space<vmem>>, vector<1x32x32xbf16>
    %16 = vector.shape_cast %15 : vector<1x32x32xbf16> to vector<32x32xbf16>
    %cst_17 = arith.constant dense<0.000000e+00> : vector<32x32xf32>
    %17 = tpu.matmul %14, %16, %cst_17 {dimension_numbers = #tpu.dot_dimension_numbers<[1], [1], [0], [0], [0, 0, 1, 0], [], []>} : vector<32x32xbf16>, vector<32x32xbf16>, vector<32x32xf32> -> vector<32x32xf32>
    %c1 = arith.constant 1 : index
    %c0_18 = arith.constant 0 : index
    %c0_19 = arith.constant 0 : index
    %18 = vector.load %arg7[%c1, %c0_18, %c0_19] : memref<2x32x32xbf16, #tpu.memory_space<vmem>>, vector<1x32x32xbf16>
    %19 = vector.shape_cast %18 : vector<1x32x32xbf16> to vector<32x32xbf16>
    %cst_20 = arith.constant dense<0.000000e+00> : vector<32x32xf32>
    %20 = tpu.matmul %19, %10, %cst_20 {dimension_numbers = #tpu.dot_dimension_numbers<[1], [0], [0], [1], [0, 0, 1, 1], [], []>} : vector<32x32xbf16>, vector<32x32xbf16>, vector<32x32xf32> -> vector<32x32xf32>
    %21 = arith.truncf %20 : vector<32x32xf32> to vector<32x32xbf16>
    %c1_21 = arith.constant 1 : index
    %c0_22 = arith.constant 0 : index
    %c0_23 = arith.constant 0 : index
    %22 = vector.load %arg3[%c1_21, %c0_22, %c0_23] : memref<2x32x32xbf16, #tpu.memory_space<vmem>>, vector<1x32x32xbf16>
    %23 = vector.shape_cast %22 : vector<1x32x32xbf16> to vector<32x32xbf16>
    %cst_24 = arith.constant dense<0.000000e+00> : vector<32x32xf32>
    %24 = tpu.matmul %21, %23, %cst_24 {dimension_numbers = #tpu.dot_dimension_numbers<[1], [1], [0], [0], [0, 0, 1, 0], [], []>} : vector<32x32xbf16>, vector<32x32xbf16>, vector<32x32xf32> -> vector<32x32xf32>
    %25 = arith.addf %17, %24 : vector<32x32xf32>
    %c0_25 = arith.constant 0 : index
    %c0_26 = arith.constant 0 : index
    %26 = vector.load %arg8[%c0_25, %c0_26] : memref<32x1xf32, #tpu.memory_space<vmem>>, vector<32x1xf32>
    %27 = vector.broadcast %26 : vector<32x1xf32> to vector<32x32xf32>
    %28 = arith.addf %25, %27 : vector<32x32xf32>
    %29 = arith.truncf %28 : vector<32x32xf32> to vector<32x32xbf16>
    %c0_27 = arith.constant 0 : index
    %c0_28 = arith.constant 0 : index
    %30 = vector.load %arg9[%c0_27, %c0_28] : memref<32x32xbf16, #tpu.memory_space<vmem>>, vector<32x32xbf16>
    %cst_29 = arith.constant dense<0.000000e+00> : vector<32x32xf32>
    %31 = tpu.matmul %30, %29, %cst_29 {dimension_numbers = #tpu.dot_dimension_numbers<[1], [0], [0], [1], [0, 0, 1, 1], [], []>} : vector<32x32xbf16>, vector<32x32xbf16>, vector<32x32xf32> -> vector<32x32xf32>
    %c0_30 = arith.constant 0 : index
    %c0_31 = arith.constant 0 : index
    %32 = vector.load %arg10[%c0_30, %c0_31] : memref<32x32xbf16, #tpu.memory_space<vmem>>, vector<32x32xbf16>
    %cst_32 = arith.constant dense<0.000000e+00> : vector<32x32xf32>
    %33 = tpu.matmul %32, %1, %cst_32 {dimension_numbers = #tpu.dot_dimension_numbers<[1], [0], [0], [1], [0, 0, 1, 1], [], []>} : vector<32x32xbf16>, vector<32x32xbf16>, vector<32x32xf32> -> vector<32x32xf32>
    %34 = arith.addf %31, %33 : vector<32x32xf32>
    %c0_33 = arith.constant 0 : index
    %c0_34 = arith.constant 0 : index
    %35 = vector.load %arg11[%c0_33, %c0_34] : memref<32x1xf32, #tpu.memory_space<vmem>>, vector<32x1xf32>
    %36 = vector.broadcast %35 : vector<32x1xf32> to vector<32x32xf32>
    %37 = arith.addf %34, %36 : vector<32x32xf32>
    %c0_35 = arith.constant 0 : index
    %38 = memref.load %arg15[%c0_35] : memref<1xf32, #tpu.memory_space<smem>>
    %cst_36 = arith.constant 0.000000e+00 : f32
    %39 = vector.broadcast %cst_36 : f32 to vector<32x32xf32>
    %40 = arith.cmpf oge, %37, %39 : vector<32x32xf32>
    %41 = vector.broadcast %38 : f32 to vector<32x32xf32>
    %42 = arith.mulf %41, %37 : vector<32x32xf32>
    %43 = arith.select %40, %37, %42 : vector<32x32xi1>, vector<32x32xf32>
    %44 = arith.truncf %43 : vector<32x32xf32> to vector<32x32xbf16>
    %c0_37 = arith.constant 0 : index
    %c0_38 = arith.constant 0 : index
    %45 = vector.load %arg17[%c0_37, %c0_38] : memref<64x32xf32, #tpu.memory_space<vmem>>, vector<32x32xf32>
    tpu.vector_store %arg17[%c0_37, %c0_38], %43 {strides = array<i32>} : memref<64x32xf32, #tpu.memory_space<vmem>>, vector<32x32xf32>,
    %46 = arith.extf %1 : vector<32x32xbf16> to vector<32x32xf32>
    %c32 = arith.constant 32 : index
    %c0_39 = arith.constant 0 : index
    %47 = vector.load %arg17[%c32, %c0_39] : memref<64x32xf32, #tpu.memory_space<vmem>>, vector<32x32xf32>
    tpu.vector_store %arg17[%c32, %c0_39], %46 {strides = array<i32>} : memref<64x32xf32, #tpu.memory_space<vmem>>, vector<32x32xf32>,
    %c0_40 = arith.constant 0 : index
    %c0_41 = arith.constant 0 : index
    %48 = vector.load %arg12[%c0_40, %c0_41] : memref<4x32xbf16, #tpu.memory_space<vmem>>, vector<4x32xbf16>
    %cst_42 = arith.constant dense<0.000000e+00> : vector<4x32xf32>
    %49 = tpu.matmul %48, %44, %cst_42 {dimension_numbers = #tpu.dot_dimension_numbers<[1], [0], [0], [1], [0, 0, 1, 1], [], []>} : vector<4x32xbf16>, vector<32x32xbf16>, vector<4x32xf32> -> vector<4x32xf32>
    %c0_43 = arith.constant 0 : index
    %c0_44 = arith.constant 0 : index
    %50 = vector.load %arg13[%c0_43, %c0_44] : memref<4x32xbf16, #tpu.memory_space<vmem>>, vector<4x32xbf16>
    %cst_45 = arith.constant dense<0.000000e+00> : vector<4x32xf32>
    %51 = tpu.matmul %50, %1, %cst_45 {dimension_numbers = #tpu.dot_dimension_numbers<[1], [0], [0], [1], [0, 0, 1, 1], [], []>} : vector<4x32xbf16>, vector<32x32xbf16>, vector<4x32xf32> -> vector<4x32xf32>
    %52 = arith.addf %49, %51 : vector<4x32xf32>
    %c0_46 = arith.constant 0 : index
    %c0_47 = arith.constant 0 : index
    %53 = vector.load %arg14[%c0_46, %c0_47] : memref<4x1xf32, #tpu.memory_space<vmem>>, vector<4x1xf32>
    %54 = vector.broadcast %53 : vector<4x1xf32> to vector<4x32xf32>
    %55 = arith.addf %52, %54 : vector<4x32xf32>
    %c0_48 = arith.constant 0 : index
    %c0_49 = arith.constant 0 : index
    %56 = vector.load %arg16[%c0_48, %c0_49] : memref<4x32xf32, #tpu.memory_space<vmem>>, vector<4x32xf32>
    tpu.vector_store %arg16[%c0_48, %c0_49], %55 {strides = array<i32>} : memref<4x32xf32, #tpu.memory_space<vmem>>, vector<4x32xf32>,
    return
  }
  func.func @transform_0(%arg0: i32) -> (i32, i32) {
    %c0_i32 = arith.constant 0 : i32
    %c0_i32_0 = arith.constant 0 : i32
    return %c0_i32, %arg0 : i32, i32
  }
  func.func @transform_1(%arg0: i32) -> (i32, i32) {
    %c0_i32 = arith.constant 0 : i32
    %c0_i32_0 = arith.constant 0 : i32
    return %c0_i32, %arg0 : i32, i32
  }
  func.func @transform_2(%arg0: i32) -> (i32, i32, i32) {
    %c0_i32 = arith.constant 0 : i32
    %c0_i32_0 = arith.constant 0 : i32
    %c0_i32_1 = arith.constant 0 : i32
    %c0_i32_2 = arith.constant 0 : i32
    return %c0_i32, %c0_i32_0, %c0_i32_1 : i32, i32, i32
  }
  func.func @transform_3(%arg0: i32) -> (i32, i32) {
    %c0_i32 = arith.constant 0 : i32
    %c0_i32_0 = arith.constant 0 : i32
    %c0_i32_1 = arith.constant 0 : i32
    return %c0_i32, %c0_i32_0 : i32, i32
  }
  func.func @transform_4(%arg0: i32) -> (i32, i32) {
    %c0_i32 = arith.constant 0 : i32
    %c0_i32_0 = arith.constant 0 : i32
    %c0_i32_1 = arith.constant 0 : i32
    return %c0_i32, %c0_i32_0 : i32, i32
  }
  func.func @transform_5(%arg0: i32) -> (i32, i32) {
    %c0_i32 = arith.constant 0 : i32
    %c0_i32_0 = arith.constant 0 : i32
    %c0_i32_1 = arith.constant 0 : i32
    return %c0_i32, %c0_i32_0 : i32, i32
  }
  func.func @transform_6(%arg0: i32) -> (i32, i32, i32) {
    %c0_i32 = arith.constant 0 : i32
    %c0_i32_0 = arith.constant 0 : i32
    %c0_i32_1 = arith.constant 0 : i32
    %c0_i32_2 = arith.constant 0 : i32
    return %c0_i32, %c0_i32_0, %c0_i32_1 : i32, i32, i32
  }
  func.func @transform_7(%arg0: i32) -> (i32, i32) {
    %c0_i32 = arith.constant 0 : i32
    %c0_i32_0 = arith.constant 0 : i32
    %c0_i32_1 = arith.constant 0 : i32
    return %c0_i32, %c0_i32_0 : i32, i32
  }
  func.func @transform_8(%arg0: i32) -> (i32, i32) {
    %c0_i32 = arith.constant 0 : i32
    %c0_i32_0 = arith.constant 0 : i32
    %c0_i32_1 = arith.constant 0 : i32
    return %c0_i32, %c0_i32_0 : i32, i32
  }
  func.func @transform_9(%arg0: i32) -> (i32, i32) {
    %c0_i32 = arith.constant 0 : i32
    %c0_i32_0 = arith.constant 0 : i32
    %c0_i32_1 = arith.constant 0 : i32
    return %c0_i32, %c0_i32_0 : i32, i32
  }
  func.func @transform_10(%arg0: i32) -> (i32, i32) {
    %c0_i32 = arith.constant 0 : i32
    %c0_i32_0 = arith.constant 0 : i32
    %c0_i32_1 = arith.constant 0 : i32
    return %c0_i32, %c0_i32_0 : i32, i32
  }
  func.func @transform_11(%arg0: i32) -> (i32, i32) {
    %c0_i32 = arith.constant 0 : i32
    %c0_i32_0 = arith.constant 0 : i32
    %c0_i32_1 = arith.constant 0 : i32
    return %c0_i32, %c0_i32_0 : i32, i32
  }
  func.func @transform_12(%arg0: i32) -> (i32, i32) {
    %c0_i32 = arith.constant 0 : i32
    %c0_i32_0 = arith.constant 0 : i32
    %c0_i32_1 = arith.constant 0 : i32
    return %c0_i32, %c0_i32_0 : i32, i32
  }
  func.func @transform_13(%arg0: i32) -> (i32, i32) {
    %c0_i32 = arith.constant 0 : i32
    %c0_i32_0 = arith.constant 0 : i32
    %c0_i32_1 = arith.constant 0 : i32
    return %c0_i32, %c0_i32_0 : i32, i32
  }
  func.func @transform_14(%arg0: i32) -> i32 {
    %c0_i32 = arith.constant 0 : i32
    %c0_i32_0 = arith.constant 0 : i32
    return %c0_i32 : i32
  }
  func.func @transform_15(%arg0: i32) -> (i32, i32) {
    %c0_i32 = arith.constant 0 : i32
    %c0_i32_0 = arith.constant 0 : i32
    return %c0_i32, %arg0 : i32, i32
  }
  func.func @transform_16(%arg0: i32) -> (i32, i32) {
    %c0_i32 = arith.constant 0 : i32
    %c0_i32_0 = arith.constant 0 : i32
    return %c0_i32, %arg0 : i32, i32
  }
}

</mosaic_0001>

<bundles_post_ra>
// kernel: tpu_custom_call.1
= control target key start
LH: loop header
LB: loop body
LE: loop exit
PB: predicated region body
PF: predicated region fallthrough
CT: control target
= control target key end

     0   :  { %s1045_s0 = inlined_call_operand.vmem [shape: bf16[4,32], index: 0, kind: input, shape index: {}]   ;;  %s1046_s1 = inlined_call_operand.vmem [shape: bf16[32,32], index: 1, kind: input, shape index: {}]   ;;  %s1047_s2 = inlined_call_operand.vmem [shape: bf16[2,32,32], index: 2, kind: input, shape index: {}]   ;;  %s1048_s3 = inlined_call_operand.vmem [shape: bf16[32,4], index: 3, kind: input, shape index: {}]   ;;  %s1049_s4 = inlined_call_operand.vmem [shape: bf16[32,32], index: 4, kind: input, shape index: {}]   ;;  %s1050_s5 = inlined_call_operand.vmem [shape: f32[32,1], index: 5, kind: input, shape index: {}]   ;;  %s1051_s6 = inlined_call_operand.vmem [shape: bf16[2,32,32], index: 6, kind: input, shape index: {}]   ;;  %s1052_s7 = inlined_call_operand.vmem [shape: f32[32,1], index: 7, kind: input, shape index: {}]   ;;  %s1053_s8 = inlined_call_operand.vmem [shape: bf16[32,32], index: 8, kind: input, shape index: {}]   ;;  %s1054_s9 = inlined_call_operand.hbm [shape: bf16[32,32], index: 9, kind: input, shape index: {}]   ;;  %s1055_s10 = inlined_call_operand.vmem [shape: f32[32,1], index: 10, kind: input, shape index: {}]   ;;  %s1056_s11 = inlined_call_operand.vmem [shape: bf16[4,32], index: 11, kind: input, shape index: {}]   ;;  %s1057_s12 = inlined_call_operand.vmem [shape: bf16[4,32], index: 12, kind: input, shape index: {}]   ;;  %s1058_s13 = inlined_call_operand.vmem [shape: f32[4,1], index: 13, kind: input, shape index: {}]   ;;  %s1059_s14 = inlined_call_operand.<no memory space> [shape: f32[1], index: 14, kind: input, shape index: {}]   ;;  %s1060_s15 = inlined_call_operand.hbm [shape: f32[4,32], index: 15, kind: output, shape index: {0}]   ;;  %s1061_s16 = inlined_call_operand.vmem [shape: f32[64,32], index: 16, kind: output, shape index: {1}]  }
   0x1   :  { %1062 = sst [smem:[#allocation9_spill]] %s1045_s0 }
   0x2   :  { %23 = vsyncpa [#allocation4], 0 }
   0x3   :  { %24 = vsyncpa [#allocation5], 0  ;;  %s47_s23 = sshll.u32 %s1054_s9, 4  ;;  %s780_s24 = smov [#allocation3]   ;;  %s48_s23 = int_to_ptr.hbm [resolvable:$true] %s47_s23 }
   0x4   :  { %s49_s25 = sshll.u32 %s780_s24, 4  ;;  %s781_s26 = smov 64   ;;  %s50_s25 = int_to_ptr.vmem [resolvable:$true] %s49_s25 }
   0x5   :  { %s782_s27 = smov 4  }
   0x6   :  { %55 = dma.hbm_to_vmem [thread:$0]  %s48_s23, 256, %s50_s25, [#allocation4], %s781_s26, %s781_s26, %s782_s27  }
   0x7   :  { %776 = dma.done.wait [#allocation4], 256  }
   0x8   :  { %777 = vsyncadd [#allocation4], 4294967040  ;;  %v783_v0 = vmov 0   ;;  %vm149_vm0 = vcmask 1041408   ;;  %s1063_s30 = sld [smem:[#allocation9_spill]]  ;;  %v879_v2 = vld [vmem:[%s1046_s1 + $0x8] sm:$0xff] }
   0x9   :  { %725 = vset.pattern.permute.xlu0 %v783_v0  ;;  %726 = vset.pattern.permute.xlu1 %v783_v0  ;;  %v704_v4 = vld [vmem:[%s1048_s3] sm:$0xff]  ;;  %v174_v5 = vld [vmem:[%s1050_s5 + $0x10] sm:$0xff]  ;;  %vm142_vm1 = vcmask 31744   ;;  %v74_v8 = vld [vmem:[%s1046_s1 + $0x8] sm:$0xff]   ;;  %vm106_vm2 = vcmask 261120   ;;  %s590_s18 = sshll.u32 %s1060_s15, 4  ;;  %s591_s18 = int_to_ptr.hbm [resolvable:$true] %s590_s18 }
   0xa   :  { %727 = vset.pattern.permute.xlu2 %v783_v0  ;;  %v72_v6 = vld [vmem:[%s1046_s1] sm:$0xff]   ;;  %119 = vmatpush.bf16.msra.mxu0 %v879_v2  ;;  %v534_v11 = vunpack.c.l.bf16 %v74_v8  ;;  %v535_v12 = vunpack.c.h.bf16 %v74_v8  ;;  %v175_v15 = vld [vmem:[%s1050_s5 + $0x18] sm:$0xff]  ;;  %v173_v16 = vld [vmem:[%s1050_s5 + $0x8] sm:$0xff]  ;;  %vm581_vm7 = vcmask 257024  }
   0xb   :  { %v894_v7 = vld [vmem:[%s1046_s1] sm:$0xff]  ;;  %v532_v9 = vunpack.c.l.bf16 %v72_v6  ;;  %v533_v10 = vunpack.c.h.bf16 %v72_v6  ;;  %188 = vperm.xlu0 %725, %v174_v5   ;;  %v705_v18 = vld [vmem:[%s1048_s3 + $0x8] sm:$0xff]  ;;  %v487_v21 = vld [vmem:[%s1055_s10 + $0x18] sm:$0xff] }
   0xc   :  { %v172_v13 = vld [vmem:[%s1050_s5] sm:$0xff]  ;;  %538 = vst.msk [vmem:[%s1061_s16 + $0x30] sm:$0xff] %vm106_vm2, %v534_v11  ;;  %v377_v19 = vld [vmem:[%s1052_s7 + $0x8] sm:$0xff]  ;;  %v715_v32 = vld [vmem:[%s1047_s2 + $0x18] sm:$0xff]  ;;  %s784_s5 = smov [#allocation6]  }
   0xd   :  { %536 = vst.msk [vmem:[%s1061_s16 + $0x20] sm:$0xff] %vm106_vm2, %v532_v9  ;;  %178 = vperm.xlu1 %726, %v172_v13   ;;  %v706_v14 = vld [vmem:[%s1049_s4] sm:$0xff]  ;;  %v707_v20 = vld [vmem:[%s1049_s4 + $0x8] sm:$0xff]  ;;  %v314_v37 = vsel %vm106_vm2, %v715_v32, 0  ;;  %v712_v51 = vld [vmem:[%s1051_s6 + $0x10] sm:$0xff]  ;;  %s588_s9 = sshll.u32 %s784_s5, 4  ;;  %s589_s9 = int_to_ptr.vmem [resolvable:$true] %s588_s9 }
   0xe   :  { %v71_v1 = vld [vmem:[%s1063_s30] sm:$0x3]  ;;  %537 = vst.msk [vmem:[%s1061_s16 + $0x28] sm:$0xff] %vm106_vm2, %v533_v10  ;;  %120 = vmatpush.bf16.msra.mxu0 %v894_v7  ;;  %v711_v33 = vld [vmem:[%s1047_s2 + $0x8] sm:$0xff]  ;;  %v713_v53 = vld [vmem:[%s1051_s6 + $0x18] sm:$0xff] }
   0xf   :  { %v151_v3 = vsel %vm149_vm0, %v71_v1, 0  ;;  %539 = vst.msk [vmem:[%s1061_s16 + $0x38] sm:$0xff] %vm106_vm2, %v535_v12  ;;  %v376_v17 = vld [vmem:[%s1052_s7] sm:$0xff]  ;;  %v355_v38 = vsel %vm106_vm2, %v711_v33, 0  ;;  %v709_v52 = vld [vmem:[%s1051_s6 + $0x8] sm:$0xff]  ;;  %v714_v54 = vld [vmem:[%s1047_s2 + $0x10] sm:$0xff] }
  0x10   :  { %160 = vmatpush.bf16.msra.mxu1 %v151_v3  ;;  %v484_v22 = vld [vmem:[%s1055_s10] sm:$0xff]  ;;  %v311_v56 = vsel %vm106_vm2, %v714_v54, 0  ;;  %v378_v58 = vld [vmem:[%s1052_s7 + $0x10] sm:$0xff]  ;;  %v379_v61 = vld [vmem:[%s1052_s7 + $0x18] sm:$0xff] }
  0x11   :  { %620 = vmatmul.msk.bf16.vlgmr.msra.gmra.mxu0 %vm106_vm2, %v706_v14  ;;  %v574_v23 = vld [vmem:[%s1058_s13] sm:$0xf]  ;;  %392 = vperm.xlu2 %727, %v378_v58   ;;  %v485_v5 = vld [vmem:[%s1055_s10 + $0x8] sm:$0xff] }
  0x12   :  { %363 = vmatpush.bf16.xpose.msrb.mxu0 %v355_v38  ;;  %v708_v50 = vld [vmem:[%s1051_s6] sm:$0xff] }
  0x13   :  { %630 = vmatmul.msk.bf16.vlgmr.msra.gmra.mxu1 %vm142_vm1, %v704_v4  ;;  %193 = vperm.xlu0 %725, %v175_v15   ;;  %v710_v55 = vld [vmem:[%s1047_s2] sm:$0xff]  ;;  %v719_v15 = vld [vmem:[#allocation3 + $0x8] sm:$0xff] }
  0x14   :  { %322 = vmatpush.bf16.xpose.msrb.mxu1 %v314_v37  ;;  %v352_v57 = vsel %vm106_vm2, %v710_v55, 0  ;;  %v718_v10 = vld [vmem:[#allocation3] sm:$0xff] }
  0x15   :  { %183 = vperm.xlu1 %726, %v173_v16  }
  0x19   :  { %397 = vperm.xlu2 %727, %v379_v61  }
  0x1a   :  { %364 = vmatpush.bf16.xpose.msrb.mxu0 %v352_v57 }
  0x1b   :  { %382 = vperm.xlu0 %725, %v376_v17  }
  0x1c   :  { %323 = vmatpush.bf16.xpose.msrb.mxu1 %v311_v56 }
  0x1d   :  { %387 = vperm.xlu1 %726, %v377_v19  }
  0x21   :  { %621 = vmatmul.msk.bf16.gmra.mxu0 %vm106_vm2, %v707_v20 }
  0x23   :  { %631 = vmatmul.msk.bf16.gmra.mxu1 %vm142_vm1, %v705_v18  ;;  %505 = vperm.xlu0 %725, %v487_v21  }
  0x24   :  { %551 = vmatpush.bf16.msra.mxu1 %v879_v2 }
  0x25   :  { %490 = vperm.xlu1 %726, %v484_v22  }
  0x28   :  { %552 = vmatpush.bf16.msra.mxu1 %v894_v7 }
  0x2b   :  { %577 = vperm.xlu0 %725, %v574_v23  }
  0x6b   :  { %v393_v16 = vpop.permute.xlu2 %392 }
  0x7d   :  { %v189_v29 = vpop.permute.xlu0 %188 }
  0x7f   :  { %v179_v31 = vpop.permute.xlu1 %178 }
  0x85   :  { %v194_v41 = vpop.permute.xlu0 %193 }
  0x87   :  { %v184_v45 = vpop.permute.xlu1 %183 }
  0x8e   :  { %v122_v25 = vpop.f32.mrf.mxu0 }
  0x90   :  { %v162_v24 = vpop.f32.mrf.mxu1 }
  0x91   :  { %v163_v42 = vadd.f32 %v162_v24, %v122_v25  ;;  %v398_v24 = vpop.permute.xlu2 %397 }
  0x93   :  { %v196_v48 = vadd.f32 %v179_v31, %v163_v42  ;;  %v383_v31 = vpop.permute.xlu0 %382  ;;  %v517_v42 = vstv %s1059_s14 }
  0x96   :  { %v124_v27 = vpop.f32.mrf.mxu0 }
  0x98   :  { %v164_v26 = vpop.f32.mrf.mxu1 }
  0x99   :  { %v165_v39 = vadd.f32 %v164_v26, %v124_v27 }
  0x9b   :  { %v197_v46 = vadd.f32 %v184_v45, %v165_v39  ;;  %v541_v39 = vld [vmem:[%s1057_s12] sm:$0x3] }
  0x9d   :  { %v200_v49 = vpack.c.bf16 %v197_v46, %v196_v48 }
  0x9e   :  { %v127_v30 = vpop.f32.mrf.mxu0 }
  0xa0   :  { %v167_v28 = vpop.f32.mrf.mxu1 }
  0xa1   :  { %v168_v34 = vadd.f32 %v167_v28, %v127_v30  ;;  %v388_v28 = vpop.permute.xlu1 %387 }
  0xa3   :  { %v198_v43 = vadd.f32 %v189_v29, %v168_v34  ;;  %v716_v34 = vld [vmem:[%s1053_s8] sm:$0xff] }
  0xa6   :  { %v129_v36 = vpop.f32.mrf.mxu0 }
  0xa8   :  { %v169_v35 = vpop.f32.mrf.mxu1 }
  0xa9   :  { %v170_v40 = vadd.f32 %v169_v35, %v129_v36  ;;  %v717_v35 = vld [vmem:[%s1053_s8 + $0x8] sm:$0xff] }
  0xab   :  { %v199_v44 = vadd.f32 %v194_v41, %v170_v40  ;;  %v491_v41 = vpop.permute.xlu1 %490 }
  0xad   :  { %v201_v47 = vpack.c.bf16 %v199_v44, %v198_v43 }
  0xaf   :  { %228 = vmatpush.bf16.msra.mxu2 %v201_v47  ;;  %274 = vmatpush.bf16.msra.mxu3 %v201_v47 }
  0xb3   :  { %229 = vmatpush.bf16.msra.mxu2 %v200_v49  ;;  %275 = vmatpush.bf16.msra.mxu3 %v200_v49 }
  0xb6   :  { %640 = vmatmul.msk.bf16.vlgmr.msra.gmra.mxu2 %vm106_vm2, %v708_v50  ;;  %654 = vmatmul.msk.bf16.vlgmr.msra.gmra.mxu3 %vm106_vm2, %v712_v51 }
  0xb7   :  { %436 = vmatpush.bf16.msrb.mxu2 %v879_v2  ;;  %v486_v2 = vld [vmem:[%s1055_s10 + $0x10] sm:$0xff] }
  0xb8   :  { %500 = vperm.xlu2 %727, %v486_v2  }
  0xbb   :  { %437 = vmatpush.bf16.msrb.mxu2 %v894_v7 }
  0xc0   :  { %495 = vperm.xlu2 %727, %v485_v5  }
  0xc6   :  { %641 = vmatmul.msk.bf16.gmra.mxu2 %vm106_vm2, %v709_v52  ;;  %655 = vmatmul.msk.bf16.gmra.mxu3 %vm106_vm2, %v713_v53 }
  0xd6   :  { %688 = vmatmul.msk.bf16.vlgmr.msrb.gmra.mxu2 %vm106_vm2, %v718_v10 }
  0xe6   :  { %689 = vmatmul.msk.bf16.gmra.mxu2 %vm106_vm2, %v719_v15 }
 0x112   :  { %v501_v37 = vpop.permute.xlu2 %500 }
 0x11a   :  { %v496_v49 = vpop.permute.xlu2 %495 }
 0x139   :  { %v231_v59 = vpop.f32.mrf.mxu2  ;;  %v277_v60 = vpop.f32.mrf.mxu3 }
 0x141   :  { %v233_v62 = vpop.f32.mrf.mxu2  ;;  %v279_v63 = vpop.f32.mrf.mxu3 }
 0x142   :  { %v241_v0 = vpack.c.bf16 %v233_v62, %v231_v59  ;;  %v287_v1 = vpack.c.bf16 %v279_v63, %v277_v60  ;;  %v506_v62 = vpop.permute.xlu0 %505 }
 0x144   :  { %668 = vmatmul.msk.bf16.vlgmr.msrb.gmra.mxu1 %vm106_vm2, %v287_v1  ;;  %678 = vmatmul.msk.bf16.vlgmr.msrb.gmra.mxu0 %vm106_vm2, %v241_v0 }
 0x149   :  { %v236_v3 = vpop.f32.mrf.mxu2  ;;  %v282_v4 = vpop.f32.mrf.mxu3 }
 0x151   :  { %v238_v6 = vpop.f32.mrf.mxu2  ;;  %v284_v7 = vpop.f32.mrf.mxu3 }
 0x152   :  { %v242_v8 = vpack.c.bf16 %v238_v6, %v236_v3  ;;  %v288_v9 = vpack.c.bf16 %v284_v7, %v282_v4  ;;  %v540_v4 = vld [vmem:[%s1056_s11] sm:$0x3] }
 0x154   :  { %669 = vmatmul.msk.bf16.gmra.mxu1 %vm106_vm2, %v288_v9  ;;  %679 = vmatmul.msk.bf16.gmra.mxu0 %vm106_vm2, %v242_v8  ;;  %v578_v9 = vpop.permute.xlu0 %577 }
 0x159   :  { %v439_v36 = vpop.f32.mrf.mxu2 }
 0x161   :  { %v441_v44 = vpop.f32.mrf.mxu2 }
 0x164   :  { %700 = vmatmul.msk.bf16.vlgmr.msra.gmra.mxu1 %vm106_vm2, %v541_v39 }
 0x169   :  { %v444_v52 = vpop.f32.mrf.mxu2 }
 0x171   :  { %v446_v59 = vpop.f32.mrf.mxu2 }
 0x1c1   :  { %v325_v11 = vpop.f32.mrf.mxu1  ;;  %v366_v12 = vpop.f32.mrf.mxu0 }
 0x1c2   :  { %v367_v25 = vadd.f32 %v366_v12, %v325_v11 }
 0x1c4   :  { %v400_v32 = vadd.f32 %v383_v31, %v367_v25 }
 0x1c9   :  { %v327_v13 = vpop.f32.mrf.mxu1  ;;  %v368_v14 = vpop.f32.mrf.mxu0 }
 0x1ca   :  { %v369_v22 = vadd.f32 %v368_v14, %v327_v13 }
 0x1cc   :  { %v401_v29 = vadd.f32 %v388_v28, %v369_v22 }
 0x1ce   :  { %v404_v33 = vpack.c.bf16 %v401_v29, %v400_v32 }
 0x1d1   :  { %v330_v17 = vpop.f32.mrf.mxu1  ;;  %v371_v18 = vpop.f32.mrf.mxu0 }
 0x1d2   :  { %v372_v19 = vadd.f32 %v371_v18, %v330_v17 }
 0x1d4   :  { %v402_v26 = vadd.f32 %v393_v16, %v372_v19 }
 0x1d9   :  { %v332_v20 = vpop.f32.mrf.mxu1  ;;  %v373_v21 = vpop.f32.mrf.mxu0 }
 0x1da   :  { %v374_v23 = vadd.f32 %v373_v21, %v332_v20 }
 0x1dc   :  { %v403_v27 = vadd.f32 %v398_v24, %v374_v23 }
 0x1de   :  { %v405_v30 = vpack.c.bf16 %v403_v27, %v402_v26 }
 0x1e0   :  { %471 = vmatpush.bf16.msrb.mxu3 %v405_v30 }
 0x1e1   :  { %v554_v5 = vpop.f32.mrf.mxu1 }
 0x1e4   :  { %472 = vmatpush.bf16.msrb.mxu3 %v404_v33 }
 0x1e7   :  { %698 = vmatmul.msk.bf16.vlgmr.msrb.gmra.mxu3 %vm106_vm2, %v716_v34 }
 0x1e9   :  { %v556_v6 = vpop.f32.mrf.mxu1 }
 0x1f7   :  { %699 = vmatmul.msk.bf16.gmra.mxu3 %vm106_vm2, %v717_v35 }
 0x26a   :  { %v474_v38 = vpop.f32.mrf.mxu3 }
 0x26b   :  { %v475_v40 = vadd.f32 %v474_v38, %v439_v36 }
 0x26d   :  { %v508_v43 = vadd.f32 %v491_v41, %v475_v40 }
 0x26f   :  { %vm513_vm3 = vcmp.ge.f32.partialorder %v508_v43, 0.0  ;;  %v518_v45 = vmul.f32 %v517_v42, %v508_v43 }
 0x271   :  { %v522_v46 = vsel %vm513_vm3, %v508_v43, %v518_v45 }
 0x272   :  { %v476_v47 = vpop.f32.mrf.mxu3  ;;  %528 = vst.msk [vmem:[%s1061_s16] sm:$0xff] %vm106_vm2, %v522_v46 }
 0x273   :  { %v477_v48 = vadd.f32 %v476_v47, %v441_v44 }
 0x275   :  { %v509_v50 = vadd.f32 %v496_v49, %v477_v48 }
 0x277   :  { %vm514_vm4 = vcmp.ge.f32.partialorder %v509_v50, 0.0  ;;  %v519_v51 = vmul.f32 %v517_v42, %v509_v50 }
 0x279   :  { %v523_v53 = vsel %vm514_vm4, %v509_v50, %v519_v51 }
 0x27a   :  { %v479_v54 = vpop.f32.mrf.mxu3  ;;  %529 = vst.msk [vmem:[%s1061_s16 + $0x8] sm:$0xff] %vm106_vm2, %v523_v53  ;;  %v526_v3 = vpack.c.bf16 %v523_v53, %v522_v46 }
 0x27b   :  { %v480_v55 = vadd.f32 %v479_v54, %v444_v52 }
 0x27d   :  { %v510_v56 = vadd.f32 %v501_v37, %v480_v55 }
 0x27f   :  { %vm515_vm5 = vcmp.ge.f32.partialorder %v510_v56, 0.0  ;;  %v520_v57 = vmul.f32 %v517_v42, %v510_v56 }
 0x281   :  { %v524_v58 = vsel %vm515_vm5, %v510_v56, %v520_v57 }
 0x282   :  { %530 = vst.msk [vmem:[%s1061_s16 + $0x10] sm:$0xff] %vm106_vm2, %v524_v58  ;;  %v481_v60 = vpop.f32.mrf.mxu3 }
 0x283   :  { %v482_v61 = vadd.f32 %v481_v60, %v446_v59 }
 0x285   :  { %v511_v63 = vadd.f32 %v506_v62, %v482_v61 }
 0x287   :  { %vm516_vm6 = vcmp.ge.f32.partialorder %v511_v63, 0.0  ;;  %v521_v0 = vmul.f32 %v517_v42, %v511_v63 }
 0x289   :  { %v525_v1 = vsel %vm516_vm6, %v511_v63, %v521_v0 }
 0x28a   :  { %531 = vst.msk [vmem:[%s1061_s16 + $0x18] sm:$0xff] %vm106_vm2, %v525_v1  ;;  %v527_v2 = vpack.c.bf16 %v525_v1, %v524_v58 }
 0x28c   :  { %567 = vmatpush.bf16.msra.mxu0 %v527_v2 }
 0x290   :  { %568 = vmatpush.bf16.msra.mxu0 %v526_v3 }
 0x293   :  { %701 = vmatmul.msk.bf16.vlgmr.msra.gmra.mxu0 %vm106_vm2, %v540_v4 }
 0x310   :  { %v570_v7 = vpop.f32.mrf.mxu0 }
 0x311   :  { %v571_v8 = vadd.f32 %v570_v7, %v554_v5 }
 0x313   :  { %v580_v10 = vadd.f32 %v578_v9, %v571_v8 }
 0x315   :  { %582 = vst.msk [vmem:[#allocation6] sm:$0xf] %vm581_vm7, %v580_v10 }
 0x316   :  { %593 = dma.vmem_to_hbm [thread:$0]  %s589_s9, 64, %s591_s18, [#allocation5]  }
 0x318   :  { %v572_v11 = vpop.f32.mrf.mxu0 }
 0x319   :  { %778 = dma.done.wait [#allocation5], 64  }
 0x31a   :  { %779 = vsyncadd [#allocation5], 4294967232 }
 0x31b   :  { %602 = vsyncpa [#allocation4], 1 }
 0x31c   :  { %603 = vsyncpa [#allocation5], 1 }

</bundles_post_ra>
